<compile_context>
chip_gen: v7x
topology: tpu7x:2x2x1
jax: 0.10.0
libtpu: 0.0.40
codegen_flags: <defaults>
</compile_context>

<pallas_src>
import jax
import jax.numpy as jnp
import numpy as np
from jax import lax
from jax.experimental import pallas as pl
from jax.experimental.pallas import tpu as pltpu

H_SP = W_SP = 18            # spatial size hard-coded in Head.extract_head_feat
HW = H_SP * W_SP            # 324
EPS = 1e-6


# ----------------------------------------------------------------------------
# Kernel 1: 1x1 conv ("feature_extractor") in the NCHW-flat layout.
#   One streamed MXU matmul over ALL (train+test) slabs:
#     x : (C_in, NB_tot*HW)  ->  y = w_t @ x + b_col : (C_out, NB_tot*HW)
# ----------------------------------------------------------------------------
def _extract_kernel(x_ref, w_ref, b_ref, y_ref):
    y_ref[...] = (
        jnp.dot(w_ref[...], x_ref[...], preferred_element_type=jnp.float32)
        + b_ref[...]
    )


def pallas_extract_1x1(x_flat, w_t, b_col):
    """x_flat: (C_in, TOT) lane-dense -> (C_out, TOT)."""
    c_out = w_t.shape[0]
    return pl.pallas_call(
        _extract_kernel,
        out_shape=jax.ShapeDtypeStruct((c_out, x_flat.shape[1]), jnp.float32),
    )(x_flat, w_t, b_col)


# ----------------------------------------------------------------------------
# Kernel 2: fused filter-prediction + test-feature encoding + classifier + bbreg.
# Lane-dense layout: channels on sublanes, HW=324 on lanes.
#   e_tr/pos_tr : (N_tr, B, C, HW)   lab : (N_tr, B, 1, HW)
#   e_te/pos_te : (N_te, B, C, HW)
#   out         : (N_te, B, 8, HW)  slab rows = [scores, ltrb0..3, 0, 0, 0]
# Grid over batch ("parallel") -> per-step VMEM is bounded and v7x megacore
# can shard sequences.
# ----------------------------------------------------------------------------
def _make_fused_head_kernel(n_tr, n_te):
    contract_lanes = (((1,), (1,)), ((), ()))     # contract last (lane) dims

    def kernel(e_tr_ref, pos_tr_ref, lab_ref, e_te_ref, pos_te_ref,
               w_enc_t_ref, b_enc_ref, pad_w_ref, b_slab_ref, out_ref):
        c = e_tr_ref.shape[1]
        hw = e_tr_ref.shape[2]

        w_enc_t = w_enc_t_ref[...]                                   # (C, C)
        pad_w = pad_w_ref[...]                                       # (8, C)
        # Hoisted bias broadcasts (JAX does not CSE broadcast_in_dim).
        b_enc_full = jnp.broadcast_to(b_enc_ref[...], (c, hw))       # (C, HW)
        b_slab_full = jnp.broadcast_to(b_slab_ref[...], (8, hw))     # (8, HW)
        row_ids = lax.broadcasted_iota(jnp.int32, (8, hw), 0)
        exp_rows = jnp.logical_and(row_ids >= 1, row_ids <= 4)       # ltrb rows

        # ---- filter_predictor: label-weighted pooling over train frames (MXU) ----
        num = jnp.zeros((1, c), jnp.float32)
        den = jnp.zeros((1, 1), jnp.float32)
        for n in range(n_tr):                                        # small static unroll
            z = e_tr_ref[n] + pos_tr_ref[n]                          # (C, HW) lane-dense
            lab = lab_ref[n]                                         # (1, HW)
            num = num + lax.dot_general(lab, z, contract_lanes,
                                        preferred_element_type=jnp.float32)  # (1, C)
            den = den + jnp.sum(lab, axis=1, keepdims=True)
        filt_row = num / (den + EPS)                                 # (1, C)
        # classifier + bb_regressor projection in one (8, C) matrix:
        # row 0 = filter (scores), rows 1..4 = filter-modulated bbreg weights.
        proj = pad_w * filt_row                                      # (8, C)

        for n in range(n_te):
            # ---- filter_predictor: test-feature encoder ----
            zt = e_te_ref[n] + pos_te_ref[n]                         # (C, HW)
            enc_t = (jnp.dot(w_enc_t, zt, preferred_element_type=jnp.float32)
                     + b_enc_full)                                   # (C, HW)
            # ---- classifier + bb_regressor: one (8,C)@(C,HW) MXU op ----
            slab_lin = (jnp.dot(proj, enc_t, preferred_element_type=jnp.float32)
                        + b_slab_full)                               # (8, HW)
            # exp() only on the ltrb rows; single unmasked (8, HW) store.
            out_ref[n] = jnp.where(exp_rows, jnp.exp(slab_lin), slab_lin)

    return kernel


def pallas_fused_head(train_feat, pos_train, train_label, test_feat, pos_test,
                      w_enc, b_enc, w_reg, b_reg):
    n_tr, batch, hw, c = train_feat.shape
    n_te = test_feat.shape[0]

    # Cheap glue transposes to the lane-dense (C, HW) working layout.
    e_tr = jnp.transpose(train_feat, (0, 1, 3, 2))       # (N_tr, B, C, HW)
    p_tr = jnp.transpose(pos_train, (0, 1, 3, 2))
    e_te = jnp.transpose(test_feat, (0, 1, 3, 2))        # (N_te, B, C, HW)
    p_te = jnp.transpose(pos_test, (0, 1, 3, 2))
    lab = train_label.reshape(n_tr, batch, 1, hw)        # free reshape

    w_enc_t = jnp.transpose(w_enc)                       # (C, C)
    b_enc_col = b_enc.reshape(-1, 1)                     # (C, 1)
    w_reg_t = jnp.transpose(w_reg)                       # (4, C)
    # 8-row projection/bias so the kernel emits one full-sublane slab per frame.
    pad_w = jnp.concatenate(
        [jnp.ones((1, c), jnp.float32), w_reg_t,
         jnp.zeros((3, c), jnp.float32)], axis=0)        # (8, C)
    b_slab = jnp.concatenate(
        [jnp.zeros((1, 1), jnp.float32), b_reg.reshape(-1, 1),
         jnp.zeros((3, 1), jnp.float32)], axis=0)        # (8, 1)

    def feat_spec(n_lead, rows):
        return pl.BlockSpec((n_lead, None, rows, hw), lambda b: (0, b, 0, 0))

    def param_spec(r, k):
        return pl.BlockSpec((r, k), lambda b: (0, 0))

    out = pl.pallas_call(
        _make_fused_head_kernel(n_tr, n_te),
        out_shape=jax.ShapeDtypeStruct((n_te, batch, 8, hw), jnp.float32),
        grid_spec=pltpu.PrefetchScalarGridSpec(
            num_scalar_prefetch=0,
            grid=(batch,),
            in_specs=[
                feat_spec(n_tr, c),      # e_tr
                feat_spec(n_tr, c),      # pos_tr
                feat_spec(n_tr, 1),      # lab
                feat_spec(n_te, c),      # e_te
                feat_spec(n_te, c),      # pos_te
                param_spec(c, c),        # w_enc_t
                param_spec(c, 1),        # b_enc_col
                param_spec(8, c),        # pad_w
                param_spec(8, 1),        # b_slab
            ],
            out_specs=pl.BlockSpec((n_te, None, 8, hw), lambda b: (0, b, 0, 0)),
        ),
        compiler_params=pltpu.CompilerParams(
            dimension_semantics=("parallel",)),
    )(e_tr, p_tr, lab, e_te, p_te, w_enc_t, b_enc_col, pad_w, b_slab)
    return out


# ----------------------------------------------------------------------------
# Synthetic submodules (deterministic params; heavy math lives in the kernels)
# ----------------------------------------------------------------------------
class FeatureExtractor1x1:
    """1x1 conv; consumes a lane-dense (C_in, NB_tot*HW) slab (NCHW-flat layout)."""

    def __init__(self, w, b):
        # w: (C_in, C_out) channels-last linear weight; stored transposed for the kernel.
        self.w_t = jnp.transpose(w)          # (C_out, C_in)
        self.b_col = b.reshape(-1, 1)        # (C_out, 1)
        self.out_channels = w.shape[1]

    def __call__(self, x_flat):
        return pallas_extract_1x1(x_flat, self.w_t, self.b_col)


class SimpleFilterPredictor:
    """Holds encoder params; its math is executed inside the fused head kernel."""

    def __init__(self, w_enc, b_enc):
        self.w_enc, self.b_enc = w_enc, b_enc


class LinearFilterClassifier:
    """Parameter-free; scores = enc . filter, computed inside the fused head kernel."""
    pass


class DenseBoxRegressor:
    """Holds bbreg params; exp((enc*filter) @ w + b), computed inside the fused kernel."""

    def __init__(self, w, b):
        self.w, self.b = w, b                # w: (C_head, 4), b: (4,)


# ----------------------------------------------------------------------------
# Head (mirrors the PyTorch module's forward semantics)
# ----------------------------------------------------------------------------
class Head:
    def __init__(self, filter_predictor, feature_extractor, classifier,
                 bb_regressor, separate_filters_for_cls_and_bbreg=False):
        self.filter_predictor = filter_predictor
        self.feature_extractor = feature_extractor
        self.classifier = classifier
        self.bb_regressor = bb_regressor
        self.separate_filters_for_cls_and_bbreg = separate_filters_for_cls_and_bbreg

    def forward(self, train_feats, test_feats, pos_train, pos_test, train_bb,
                *args, **kwargs):
        assert train_bb.ndim == 3
        num_sequences = train_bb.shape[1]
        for i, (train_feat, test_feat) in enumerate(zip(train_feats, test_feats)):
            if train_feat.ndim == 5:
                train_feat = train_feat.reshape(-1, *train_feat.shape[-3:])
            if test_feat.ndim == 5:
                test_feat = test_feat.reshape(-1, *test_feat.shape[-3:])
            train_feat = train_feat.reshape(-1, num_sequences, *test_feat.shape[-2:])
            test_feat = test_feat.reshape(-1, num_sequences, *test_feat.shape[-2:])
            # One streamed pallas matmul extracts head features for train AND test.
            train_feat, test_feat = self.extract_head_feat_pair(train_feat, test_feat)
            train_feats[i] = train_feat
            test_feats[i] = test_feat
        # filter prediction + encoding + classification + box regression fused into
        # a single pallas_call (shared filter, i.e. separate_filters_... = False).
        train_label = args[0]
        target_scores, bbox_preds = self._fused_cls_bbreg(
            train_feats[0], test_feats[0], pos_train, pos_test, train_label)
        return (target_scores, bbox_preds)

    # ---- feature extraction (faithful to PyTorch's reshape semantics) ----
    def extract_head_feat_pair(self, train_feat, test_feat):
        if self.feature_extractor is None:
            return train_feat, test_feat
        shapes, slabs = [], []
        for feat in (train_feat, test_feat):
            n, b, hw, c = feat.shape
            assert hw == H_SP * W_SP, "Head.extract_head_feat assumes 18x18 spatial"
            shapes.append((n, b, hw))
            # Same flat-memory reinterpretation as feat.reshape(N*B, C, 18, 18) in
            # PyTorch, with the trailing spatial dims merged (free reshape).
            slabs.append(feat.reshape(n * b, c, hw))
        x_cat = jnp.concatenate(slabs, axis=0)                       # (NB_tot, C_in, HW)
        nb_tot, c_in, hw = x_cat.shape
        # Glue relayout so the kernel does ONE streamed MXU matmul for everything.
        x_flat = jnp.transpose(x_cat, (1, 0, 2)).reshape(c_in, nb_tot * hw)
        y_flat = self.feature_extractor(x_flat)                      # (C_out, NB_tot*HW)
        c_out = y_flat.shape[0]
        y = jnp.transpose(y_flat.reshape(c_out, nb_tot, hw), (1, 0, 2))  # (NB_tot, C_out, HW)
        nb_tr = shapes[0][0] * shapes[0][1]
        outs = []
        for (n, b, hw_s), y_part in zip(shapes, (y[:nb_tr], y[nb_tr:])):
            # output.flatten(-2).reshape(N, B, HW, C_out) -- same flat order as PyTorch.
            outs.append(y_part.reshape(n, b, hw_s, c_out))
        return outs[0], outs[1]

    def extract_head_feat(self, feat, num_sequences=None):
        if self.feature_extractor is None:
            return feat
        n, b, hw, c = feat.shape
        assert hw == H_SP * W_SP, "Head.extract_head_feat assumes 18x18 spatial"
        x = feat.reshape(n * b, c, hw)
        x_flat = jnp.transpose(x, (1, 0, 2)).reshape(c, -1)
        y_flat = self.feature_extractor(x_flat)
        c_out = y_flat.shape[0]
        y = jnp.transpose(y_flat.reshape(c_out, n * b, hw), (1, 0, 2))
        return y.reshape(n, b, hw, c_out)

    # ---- fused filter + classifier + bb_regressor ----
    def _fused_cls_bbreg(self, train_feat, test_feat, pos_train, pos_test, train_label):
        out = pallas_fused_head(
            train_feat, pos_train, train_label, test_feat, pos_test,
            self.filter_predictor.w_enc, self.filter_predictor.b_enc,
            self.bb_regressor.w, self.bb_regressor.b)
        n_te, bs = out.shape[0], out.shape[1]
        # Cheap glue slices of the lane-dense (8, HW) slabs, then free reshapes.
        target_scores = out[:, :, 0, :].reshape(n_te, bs, H_SP, W_SP)
        bbox_preds = out[:, :, 1:5, :].reshape(n_te, bs, 4, H_SP, W_SP)
        return target_scores, bbox_preds


# ----------------------------------------------------------------------------
# Pure-JAX reference for verification (same semantics, plain XLA ops)
# ----------------------------------------------------------------------------
def reference_forward(train_in, test_in, pos_train, pos_test, train_bb, train_label, p):
    num_sequences = train_bb.shape[1]
    tr = train_in.reshape(-1, num_sequences, *test_in.shape[-2:])
    te = test_in.reshape(-1, num_sequences, *test_in.shape[-2:])

    def extract(feat):
        n, b, hw, c = feat.shape
        inp = feat.reshape(n * b, c, H_SP, W_SP)
        x = jnp.transpose(inp, (0, 2, 3, 1))
        y = jnp.einsum('nhwc,cd->nhwd', x, p['w_fe']) + p['b_fe']
        out = jnp.transpose(y, (0, 3, 1, 2))
        out = out.reshape(out.shape[0], out.shape[1], -1)
        return out.reshape(n, b, hw, out.shape[-2])

    tr = extract(tr)
    te = extract(te)
    z_tr = tr + pos_train
    lab = train_label[..., None]
    filt = jnp.sum(z_tr * lab, axis=(0, 2)) / (jnp.sum(lab, axis=(0, 2)) + EPS)
    enc = jnp.einsum('nbhc,cd->nbhd', te + pos_test, p['w_enc']) + p['b_enc']
    scores = jnp.sum(enc * filt[None, :, None, :], axis=-1)
    scores = scores.reshape(te.shape[0], num_sequences, H_SP, W_SP)
    mod = enc * filt[None, :, None, :]
    dense = jnp.einsum('nbhc,cd->nbhd', mod, p['w_reg']) + p['b_reg']
    ltrb = jnp.exp(dense)
    bb = jnp.transpose(ltrb, (0, 1, 3, 2)).reshape(te.shape[0], num_sequences, 4,
                                                   H_SP, W_SP)
    return scores, bb


# ----------------------------------------------------------------------------
# Main
# ----------------------------------------------------------------------------
if __name__ == "__main__":
    key = jax.random.PRNGKey(0)
    ks = jax.random.split(key, 12)

    N_TR, N_TE, B = 2, 1, 2
    C_IN, C_HEAD = 32, 16

    # Inputs (train/test backbone feats arrive as (frames*seqs, HW, C))
    train_in = jax.random.normal(ks[0], (N_TR * B, HW, C_IN), jnp.float32)
    test_in = jax.random.normal(ks[1], (N_TE * B, HW, C_IN), jnp.float32)
    pos_train = 0.1 * jax.random.normal(ks[2], (N_TR, B, HW, C_HEAD), jnp.float32)
    pos_test = 0.1 * jax.random.normal(ks[3], (N_TE, B, HW, C_HEAD), jnp.float32)
    train_bb = jnp.abs(jax.random.normal(ks[4], (N_TR, B, 4), jnp.float32))
    train_label = jax.nn.softmax(
        jax.random.normal(ks[5], (N_TR, B, HW), jnp.float32), axis=-1)

    # Deterministic parameters
    params = {
        'w_fe': 0.05 * jax.random.normal(ks[6], (C_IN, C_HEAD), jnp.float32),
        'b_fe': 0.01 * jax.random.normal(ks[7], (C_HEAD,), jnp.float32),
        'w_enc': 0.05 * jax.random.normal(ks[8], (C_HEAD, C_HEAD), jnp.float32),
        'b_enc': 0.01 * jax.random.normal(ks[9], (C_HEAD,), jnp.float32),
        'w_reg': 0.05 * jax.random.normal(ks[10], (C_HEAD, 4), jnp.float32),
        'b_reg': 0.01 * jax.random.normal(ks[11], (4,), jnp.float32),
    }

    head = Head(
        filter_predictor=SimpleFilterPredictor(params['w_enc'], params['b_enc']),
        feature_extractor=FeatureExtractor1x1(params['w_fe'], params['b_fe']),
        classifier=LinearFilterClassifier(),
        bb_regressor=DenseBoxRegressor(params['w_reg'], params['b_reg']),
        separate_filters_for_cls_and_bbreg=False,
    )

    target_scores, bbox_preds = head.forward(
        [train_in], [test_in], pos_train, pos_test, train_bb, train_label)
    target_scores = jax.block_until_ready(target_scores)
    bbox_preds = jax.block_until_ready(bbox_preds)

    ref_scores, ref_bb = reference_forward(
        train_in, test_in, pos_train, pos_test, train_bb, train_label, params)

    assert target_scores.shape == (N_TE, B, H_SP, W_SP)
    assert bbox_preds.shape == (N_TE, B, 4, H_SP, W_SP)
    np.testing.assert_allclose(np.asarray(target_scores), np.asarray(ref_scores),
                               rtol=2e-4, atol=2e-4)
    np.testing.assert_allclose(np.asarray(bbox_preds), np.asarray(ref_bb),
                               rtol=2e-4, atol=2e-4)
    print("KERNEL_OK")
</pallas_src>

<mosaic_0001>
module attributes {stable_mosaic.version = 11 : i64} {
  func.func @_extract_kernel(%arg0: memref<32x1944xf32, #tpu.memory_space<vmem>>, %arg1: memref<16x32xf32, #tpu.memory_space<vmem>>, %arg2: memref<16x1xf32, #tpu.memory_space<vmem>>, %arg3: memref<16x1944xf32, #tpu.memory_space<vmem>>) attributes {dimension_semantics = [], scalar_prefetch = 0 : i64, scratch_operands = 0 : i64, tpu.core_type = #tpu.core_type<tc>} {
    %c0 = arith.constant 0 : index
    %c0_0 = arith.constant 0 : index
    %0 = vector.load %arg1[%c0, %c0_0] : memref<16x32xf32, #tpu.memory_space<vmem>>, vector<16x32xf32>
    %c0_1 = arith.constant 0 : index
    %c0_2 = arith.constant 0 : index
    %1 = vector.load %arg0[%c0_1, %c0_2] : memref<32x1944xf32, #tpu.memory_space<vmem>>, vector<32x1944xf32>
    %cst = arith.constant dense<0.000000e+00> : vector<16x1944xf32>
    %2 = tpu.matmul %0, %1, %cst {dimension_numbers = #tpu.dot_dimension_numbers<[1], [0], [0], [1], [0, 0, 1, 1], [], []>} : vector<16x32xf32>, vector<32x1944xf32>, vector<16x1944xf32> -> vector<16x1944xf32>
    %c0_3 = arith.constant 0 : index
    %c0_4 = arith.constant 0 : index
    %3 = vector.load %arg2[%c0_3, %c0_4] : memref<16x1xf32, #tpu.memory_space<vmem>>, vector<16x1xf32>
    %4 = vector.broadcast %3 : vector<16x1xf32> to vector<16x1944xf32>
    %5 = arith.addf %2, %4 : vector<16x1944xf32>
    %c0_5 = arith.constant 0 : index
    %c0_6 = arith.constant 0 : index
    %6 = vector.load %arg3[%c0_5, %c0_6] : memref<16x1944xf32, #tpu.memory_space<vmem>>, vector<16x1944xf32>
    tpu.vector_store %arg3[%c0_5, %c0_6], %5 {strides = array<i32>} : memref<16x1944xf32, #tpu.memory_space<vmem>>, vector<16x1944xf32>,
    return
  }
}

</mosaic_0001>

<bundles_post_ra>
// kernel: tpu_custom_call.1
= control target key start
LH: loop header
LB: loop body
LE: loop exit
PB: predicated region body
PF: predicated region fallthrough
CT: control target
= control target key end

     0   :  { %8 = vsyncpa [#allocation3], 0  ;;  %s1073_s0 = inlined_call_operand.hbm [shape: f32[32,1944], index: 0, kind: input, shape index: {}]   ;;  %s1074_s1 = inlined_call_operand.vmem [shape: f32[16,32], index: 1, kind: input, shape index: {}]   ;;  %s1075_s2 = inlined_call_operand.vmem [shape: f32[16,1], index: 2, kind: input, shape index: {}]   ;;  %s1076_s3 = inlined_call_operand.hbm [shape: f32[16,1944], index: 3, kind: output, shape index: {}]  }
   0x1   :  { %9 = vsyncpa [#allocation4], 0  ;;  %s915_s12 = smov [#allocation2]   ;;  %s867_s16 = scalar_lea.hbm %s1073_s0, 8192 }
   0x2   :  { %s15_s13 = sshll.u32 %s915_s12, 4  ;;  %p868_p0 = scmp.ne.s32.totalorder %s1073_s0, %s867_s16  ;;  %s16_s13 = int_to_ptr.vmem [resolvable:$true] %s15_s13 }
   0x3   :  { %p871_p1 = scmp.lt.u32.totalorder %s867_s16, %s1073_s0 }
   0x5   :  { %p873_p2 = pnand %p871_p1, %p868_p0 }
   0x7   :  { %876 = shalt.err (!%p873_p2)
}
   0x8   :  { %s877_s21 = scalar_lea.vmem %s16_s13, 8192  ;;  %p882_p4 = scmp.lt.s32.totalorder %s16_s13, %s16_s13 }
   0x9   :  { %p878_p3 = scmp.ne.s32.totalorder %s16_s13, %s877_s21  ;;  %p883_p5 = scmp.lt.s32.totalorder %s877_s21, %s877_s21 }
   0xb   :  { %p884_p6 = por %p883_p5, %p882_p4 }
   0xd   :  { %p885_p7 = pnand %p884_p6, %p878_p3 }
   0xf   :  { %888 = shalt.err (!%p885_p7)
}
  0x10   :  { %s916_s22 = smov 2048   ;;  %s917_s23 = smov 128  }
  0x11   :  { %21 = dma.hbm_to_vmem [thread:$0]  %s1073_s0, 8192, %s16_s13, [#allocation3], %s916_s22, %s916_s22, %s917_s23  }
  0x12   :  { %911 = dma.done.wait [#allocation3], 8192  }
  0x13   :  { %912 = vsyncadd [#allocation3], 4294959104  ;;  %v918_v0 = vmov 0.0   ;;  %v919_v1 = vmov 0   ;;  %v32_v2 = vld [vmem:[#allocation2 + $0x8] sm:$0xff]  ;;  %v34_v4 = vld [vmem:[#allocation2 + $0x18] sm:$0xff] }
  0x14   :  { %178 = vmatprep.mubr.f32.mxu0 %v918_v0  ;;  %255 = vmatprep.mubr.f32.mxu1 %v918_v0  ;;  %v48_v3 = vld [vmem:[#allocation2 + $0x88] sm:$0xff]  ;;  %v50_v6 = vld [vmem:[#allocation2 + $0x98] sm:$0xff]  ;;  %v31_v7 = vld [vmem:[#allocation2] sm:$0xff]  ;;  %vm107_vm0 = vcmask 261120   ;;  %vm745_vm1 = vcmask 195584  }
  0x15   :  { %866 = vset.pattern.permute.xlu0 %v919_v1  ;;  %v796_v5 = vpack.c.bf16 %v48_v3, %v32_v2  ;;  %v47_v8 = vld [vmem:[#allocation2 + $0x80] sm:$0xff]  ;;  %v804_v9 = vpack.c.bf16 %v50_v6, %v34_v4  ;;  %v33_v11 = vld [vmem:[#allocation2 + $0x10] sm:$0xff]  ;;  %v64_v13 = vld [vmem:[#allocation2 + $0x108] sm:$0xff] }
  0x16   :  { %v798_v10 = vpack.c.bf16 %v47_v8, %v31_v7  ;;  %v49_v12 = vld [vmem:[#allocation2 + $0x90] sm:$0xff]  ;;  %v80_v15 = vld [vmem:[#allocation2 + $0x188] sm:$0xff]  ;;  %v66_v16 = vld [vmem:[#allocation2 + $0x118] sm:$0xff] }
  0x17   :  { %797 = vmatprep.subr.bf16.mxu0 %v796_v5  ;;  %v806_v14 = vpack.c.bf16 %v49_v12, %v33_v11  ;;  %v82_v17 = vld [vmem:[#allocation2 + $0x198] sm:$0xff]  ;;  %805 = vmatprep.subr.bf16.mxu1 %v804_v9  ;;  %v800_v18 = vpack.c.bf16 %v80_v15, %v64_v13  ;;  %v63_v20 = vld [vmem:[#allocation2 + $0x100] sm:$0xff]  ;;  %v65_v22 = vld [vmem:[#allocation2 + $0x110] sm:$0xff] }
  0x18   :  { %799 = vmatpush1.bf16.msra.mxu0 %v798_v10  ;;  %v808_v19 = vpack.c.bf16 %v82_v17, %v66_v16  ;;  %v79_v21 = vld [vmem:[#allocation2 + $0x180] sm:$0xff]  ;;  %v81_v24 = vld [vmem:[#allocation2 + $0x190] sm:$0xff]  ;;  %v36_v25 = vld [vmem:[#allocation2 + $0x28] sm:$0xff] }
  0x19   :  { %807 = vmatpush1.bf16.msra.mxu1 %v806_v14  ;;  %v802_v23 = vpack.c.bf16 %v79_v21, %v63_v20  ;;  %801 = vmatprep.subr.bf16.mxu0 %v800_v18  ;;  %v810_v26 = vpack.c.bf16 %v81_v24, %v65_v22  ;;  %v52_v27 = vld [vmem:[#allocation2 + $0xa8] sm:$0xff]  ;;  %v38_v28 = vld [vmem:[#allocation2 + $0x38] sm:$0xff]  ;;  %v35_v32 = vld [vmem:[#allocation2 + $0x20] sm:$0xff] }
  0x1a   :  { %809 = vmatprep.subr.bf16.mxu1 %v808_v19  ;;  %v54_v29 = vld [vmem:[#allocation2 + $0xb8] sm:$0xff]  ;;  %v812_v30 = vpack.c.bf16 %v52_v27, %v36_v25  ;;  %v51_v33 = vld [vmem:[#allocation2 + $0xa0] sm:$0xff]  ;;  %v37_v34 = vld [vmem:[#allocation2 + $0x30] sm:$0xff] }
  0x1b   :  { %v820_v31 = vpack.c.bf16 %v54_v29, %v38_v28  ;;  %v961_v35 = vld [vmem:[%s1074_s1] sm:$0xff]  ;;  %v814_v36 = vpack.c.bf16 %v51_v33, %v35_v32  ;;  %v53_v37 = vld [vmem:[#allocation2 + $0xb0] sm:$0xff]  ;;  %v68_v38 = vld [vmem:[#allocation2 + $0x128] sm:$0xff] }
  0x1c   :  { %803 = vmatpush1.bf16.msra.mxu0 %v802_v23  ;;  %v822_v39 = vpack.c.bf16 %v53_v37, %v37_v34  ;;  %v84_v40 = vld [vmem:[#allocation2 + $0x1a8] sm:$0xff]  ;;  %v70_v41 = vld [vmem:[#allocation2 + $0x138] sm:$0xff]  ;;  %v67_v44 = vld [vmem:[#allocation2 + $0x120] sm:$0xff] }
  0x1d   :  { %811 = vmatpush1.bf16.msra.mxu1 %v810_v26  ;;  %813 = vmatprep.subr.bf16.mxu0 %v812_v30  ;;  %v86_v42 = vld [vmem:[#allocation2 + $0x1b8] sm:$0xff]  ;;  %v816_v43 = vpack.c.bf16 %v84_v40, %v68_v38  ;;  %v83_v45 = vld [vmem:[#allocation2 + $0x1a0] sm:$0xff]  ;;  %v69_v46 = vld [vmem:[#allocation2 + $0x130] sm:$0xff] }
  0x1e   :  { %821 = vmatprep.subr.bf16.mxu1 %v820_v31  ;;  %v824_v47 = vpack.c.bf16 %v86_v42, %v70_v41  ;;  %v85_v48 = vld [vmem:[#allocation2 + $0x1b0] sm:$0xff]  ;;  %v40_v49 = vld [vmem:[#allocation2 + $0x48] sm:$0xff]  ;;  %v818_v52 = vpack.c.bf16 %v83_v45, %v67_v44  ;;  %v42_v53 = vld [vmem:[#allocation2 + $0x58] sm:$0xff] }
  0x1f   :  { %780 = vmatmul.mubr.msk.f32.vlgmr.msra.gmra.mrb[0].mxu0 %vm107_vm0, %v961_v35  ;;  %v56_v50 = vld [vmem:[#allocation2 + $0xc8] sm:$0xff]  ;;  %v58_v54 = vld [vmem:[#allocation2 + $0xd8] sm:$0xff]  ;;  %v826_v55 = vpack.c.bf16 %v85_v48, %v69_v46  ;;  %v39_v56 = vld [vmem:[#allocation2 + $0x40] sm:$0xff] }
  0x20   :  { %782 = vmatmul.mubr.msk.f32.vlgmr.msra.gmra.mrb[0].mxu1 %vm107_vm0, %v961_v35  ;;  %815 = vmatpush1.bf16.msra.mxu0 %v814_v36  ;;  %v970_v51 = vld [vmem:[%s1074_s1 + $0x8] sm:$0xff]  ;;  %v55_v57 = vld [vmem:[#allocation2 + $0xc0] sm:$0xff]  ;;  %v828_v58 = vpack.c.bf16 %v56_v50, %v40_v49  ;;  %v41_v59 = vld [vmem:[#allocation2 + $0x50] sm:$0xff]  ;;  %v836_v61 = vpack.c.bf16 %v58_v54, %v42_v53 }
  0x21   :  { %823 = vmatpush1.bf16.msra.mxu1 %v822_v39  ;;  %184 = vmatprep.mubr.f32.mxu0 %v918_v0  ;;  %v57_v60 = vld [vmem:[#allocation2 + $0xd0] sm:$0xff]  ;;  %v72_v62 = vld [vmem:[#allocation2 + $0x148] sm:$0xff]  ;;  %v830_v1 = vpack.c.bf16 %v55_v57, %v39_v56  ;;  %v74_v2 = vld [vmem:[#allocation2 + $0x158] sm:$0xff] }
  0x22   :  { %261 = vmatprep.mubr.f32.mxu1 %v918_v0  ;;  %817 = vmatprep.subr.bf16.mxu0 %v816_v43  ;;  %v88_v63 = vld [vmem:[#allocation2 + $0x1c8] sm:$0xff]  ;;  %v90_v3 = vld [vmem:[#allocation2 + $0x1d8] sm:$0xff]  ;;  %v838_v4 = vpack.c.bf16 %v57_v60, %v41_v59  ;;  %v71_v5 = vld [vmem:[#allocation2 + $0x140] sm:$0xff] }
  0x23   :  { %781 = vmatmul.mubr.msk.f32.gmra.mrb[2].mxu0 %vm107_vm0, %v970_v51  ;;  %825 = vmatprep.subr.bf16.mxu1 %v824_v47  ;;  %v87_v6 = vld [vmem:[#allocation2 + $0x1c0] sm:$0xff]  ;;  %v832_v7 = vpack.c.bf16 %v88_v63, %v72_v62  ;;  %v73_v8 = vld [vmem:[#allocation2 + $0x150] sm:$0xff]  ;;  %v840_v10 = vpack.c.bf16 %v90_v3, %v74_v2  ;;  %v44_v11 = vld [vmem:[#allocation2 + $0x68] sm:$0xff] }
  0x24   :  { %783 = vmatmul.mubr.msk.f32.gmra.mrb[2].mxu1 %vm107_vm0, %v970_v51  ;;  %819 = vmatpush1.bf16.msra.mxu0 %v818_v52  ;;  %v89_v9 = vld [vmem:[#allocation2 + $0x1d0] sm:$0xff]  ;;  %v60_v12 = vld [vmem:[#allocation2 + $0xe8] sm:$0xff]  ;;  %v834_v13 = vpack.c.bf16 %v87_v6, %v71_v5  ;;  %v46_v14 = vld [vmem:[#allocation2 + $0x78] sm:$0xff] }
  0x25   :  { %827 = vmatpush1.bf16.msra.mxu1 %v826_v55  ;;  %332 = vmatprep.mubr.f32.mxu0 %v918_v0  ;;  %v62_v15 = vld [vmem:[#allocation2 + $0xf8] sm:$0xff]  ;;  %v842_v16 = vpack.c.bf16 %v89_v9, %v73_v8  ;;  %v43_v17 = vld [vmem:[#allocation2 + $0x60] sm:$0xff]  ;;  %v844_v19 = vpack.c.bf16 %v60_v12, %v44_v11  ;;  %v45_v20 = vld [vmem:[#allocation2 + $0x70] sm:$0xff] }
  0x26   :  { %409 = vmatprep.mubr.f32.mxu1 %v918_v0  ;;  %829 = vmatprep.subr.bf16.mxu0 %v828_v58  ;;  %v59_v18 = vld [vmem:[#allocation2 + $0xe0] sm:$0xff]  ;;  %v61_v21 = vld [vmem:[#allocation2 + $0xf0] sm:$0xff]  ;;  %v852_v22 = vpack.c.bf16 %v62_v15, %v46_v14  ;;  %v76_v23 = vld [vmem:[#allocation2 + $0x168] sm:$0xff] }
  0x27   :  { %784 = vmatmul.mubr.msk.f32.vlgmr.msra.gmra.mrb[4].mxu0 %vm107_vm0, %v961_v35  ;;  %837 = vmatprep.subr.bf16.mxu1 %v836_v61  ;;  %v92_v24 = vld [vmem:[#allocation2 + $0x1e8] sm:$0xff]  ;;  %v846_v25 = vpack.c.bf16 %v59_v18, %v43_v17  ;;  %v78_v26 = vld [vmem:[#allocation2 + $0x178] sm:$0xff]  ;;  %v854_v28 = vpack.c.bf16 %v61_v21, %v45_v20  ;;  %v75_v29 = vld [vmem:[#allocation2 + $0x160] sm:$0xff] }
  0x28   :  { %786 = vmatmul.mubr.msk.f32.vlgmr.msra.gmra.mrb[4].mxu1 %vm107_vm0, %v961_v35  ;;  %831 = vmatpush1.bf16.msra.mxu0 %v830_v1  ;;  %v94_v27 = vld [vmem:[#allocation2 + $0x1f8] sm:$0xff]  ;;  %v91_v30 = vld [vmem:[#allocation2 + $0x1e0] sm:$0xff]  ;;  %v848_v31 = vpack.c.bf16 %v92_v24, %v76_v23  ;;  %v77_v32 = vld [vmem:[#allocation2 + $0x170] sm:$0xff] }
  0x29   :  { %839 = vmatpush1.bf16.msra.mxu1 %v838_v4  ;;  %338 = vmatprep.mubr.f32.mxu0 %v918_v0  ;;  %v93_v33 = vld [vmem:[#allocation2 + $0x1f0] sm:$0xff]  ;;  %v856_v34 = vpack.c.bf16 %v94_v27, %v78_v26  ;;  %v850_v36 = vpack.c.bf16 %v91_v30, %v75_v29  ;;  %v95_v38 = vld [vmem:[%s1075_s2] sm:$0xff]  ;;  %v96_v39 = vld [vmem:[%s1075_s2 + $0x8] sm:$0xff]  ;;  %s920_s2 = smov [#allocation5]  }
  0x2a   :  { %415 = vmatprep.mubr.f32.mxu1 %v918_v0  ;;  %833 = vmatprep.subr.bf16.mxu0 %v832_v7  ;;  %v858_v37 = vpack.c.bf16 %v93_v33, %v77_v32  ;;  %s768_s5 = sshll.u32 %s920_s2, 4  ;;  %s769_s5 = int_to_ptr.vmem [resolvable:$true] %s768_s5 }
  0x2b   :  { %785 = vmatmul.mubr.msk.f32.gmra.mrb[6].mxu0 %vm107_vm0, %v970_v51  ;;  %841 = vmatprep.subr.bf16.mxu1 %v840_v10  ;;  %s889_s6 = scalar_lea.vmem %s769_s5, 4096  ;;  %p894_p9 = scmp.lt.s32.totalorder %s769_s5, %s769_s5 }
  0x2c   :  { %787 = vmatmul.mubr.msk.f32.gmra.mrb[6].mxu1 %vm107_vm0, %v970_v51  ;;  %835 = vmatpush1.bf16.msra.mxu0 %v834_v13  ;;  %p890_p8 = scmp.ne.s32.totalorder %s769_s5, %s889_s6  ;;  %p895_p10 = scmp.lt.s32.totalorder %s889_s6, %s889_s6 }
  0x2d   :  { %843 = vmatpush1.bf16.msra.mxu1 %v842_v16  ;;  %486 = vmatprep.mubr.f32.mxu0 %v918_v0 }
  0x2e   :  { %563 = vmatprep.mubr.f32.mxu1 %v918_v0  ;;  %845 = vmatprep.subr.bf16.mxu0 %v844_v19  ;;  %p896_p11 = por %p895_p10, %p894_p9 }
  0x2f   :  { %788 = vmatmul.mubr.msk.f32.vlgmr.msra.gmra.mrb[8].mxu0 %vm107_vm0, %v961_v35  ;;  %853 = vmatprep.subr.bf16.mxu1 %v852_v22 }
  0x30   :  { %790 = vmatmul.mubr.msk.f32.vlgmr.msra.gmra.mrb[8].mxu1 %vm107_vm0, %v961_v35  ;;  %847 = vmatpush1.bf16.msra.mxu0 %v846_v25  ;;  %p897_p12 = pnand %p896_p11, %p890_p8 }
  0x31   :  { %855 = vmatpush1.bf16.msra.mxu1 %v854_v28  ;;  %492 = vmatprep.mubr.f32.mxu0 %v918_v0 }
  0x32   :  { %569 = vmatprep.mubr.f32.mxu1 %v918_v0  ;;  %849 = vmatprep.subr.bf16.mxu0 %v848_v31 }
  0x33   :  { %789 = vmatmul.mubr.msk.f32.gmra.mrb[10].mxu0 %vm107_vm0, %v970_v51  ;;  %857 = vmatprep.subr.bf16.mxu1 %v856_v34 }
  0x34   :  { %791 = vmatmul.mubr.msk.f32.gmra.mrb[10].mxu1 %vm107_vm0, %v970_v51  ;;  %851 = vmatpush1.bf16.msra.mxu0 %v850_v36 }
  0x35   :  { %859 = vmatpush1.bf16.msra.mxu1 %v858_v37  ;;  %640 = vmatprep.mubr.f32.mxu0 %v918_v0 }
  0x36   :  { %717 = vmatprep.mubr.f32.mxu1 %v918_v0  ;;  %99 = vperm.xlu0 %866, %v95_v38  }
  0x37   :  { %792 = vmatmul.mubr.msk.f32.vlgmr.msra.gmra.mrb[12].mxu0 %vm107_vm0, %v961_v35 }
  0x38   :  { %794 = vmatmul.mubr.msk.f32.vlgmr.msra.gmra.mrb[12].mxu1 %vm107_vm0, %v961_v35  ;;  %646 = vmatprep.mubr.f32.mxu0 %v918_v0 }
  0x39   :  { %723 = vmatprep.mubr.f32.mxu1 %v918_v0 }
  0x3a   :  { %104 = vperm.xlu0 %866, %v96_v39  }
  0x3b   :  { %793 = vmatmul.mubr.msk.f32.gmra.mrb[14].mxu0 %vm107_vm0, %v970_v51 }
  0x3c   :  { %795 = vmatmul.mubr.msk.f32.gmra.mrb[14].mxu1 %vm107_vm0, %v970_v51 }
  0xb5   :  { %v1020_v40 = vpop.permute.xlu0 %99 }
  0xb9   :  { %v1025_v0 = vpop.permute.xlu0 %104 }
  0xf2   :  { %v180_v41 = vpop.f32.mrb[0].mxu0 }
  0xf3   :  { %v257_v42 = vpop.f32.mrb[0].mxu1  ;;  %v181_v43 = vadd.f32 %v180_v41, %v1020_v40  ;;  %v182_v44 = vpop.f32.mrb[1].mxu0 }
  0xf4   :  { %v258_v35 = vadd.f32 %v257_v42, %v1020_v40  ;;  %v183_v45 = vadd.f32 %v182_v44, %v1020_v40  ;;  %v259_v46 = vpop.f32.mrb[1].mxu1 }
  0xf5   :  { %730 = vst [vmem:[#allocation5] sm:$0xff] %v181_v43  ;;  %v260_v47 = vadd.f32 %v259_v46, %v1020_v40 }
  0xf6   :  { %732 = vst [vmem:[#allocation5 + $0x10] sm:$0xff] %v258_v35  ;;  %731 = vst [vmem:[#allocation5 + $0x8] sm:$0xff] %v183_v45  ;;  %v186_v48 = vpop.f32.mrb[2].mxu0 }
  0xf7   :  { %733 = vst [vmem:[#allocation5 + $0x18] sm:$0xff] %v260_v47  ;;  %v263_v49 = vpop.f32.mrb[2].mxu1  ;;  %v187_v50 = vadd.f32 %v186_v48, %v1025_v0  ;;  %v188_v51 = vpop.f32.mrb[3].mxu0 }
  0xf8   :  { %v264_v52 = vadd.f32 %v263_v49, %v1025_v0  ;;  %v189_v53 = vadd.f32 %v188_v51, %v1025_v0  ;;  %v265_v54 = vpop.f32.mrb[3].mxu1 }
  0xf9   :  { %747 = vst [vmem:[#allocation5 + $0x80] sm:$0xff] %v187_v50  ;;  %v266_v55 = vadd.f32 %v265_v54, %v1025_v0 }
  0xfa   :  { %749 = vst [vmem:[#allocation5 + $0x90] sm:$0xff] %v264_v52  ;;  %748 = vst [vmem:[#allocation5 + $0x88] sm:$0xff] %v189_v53  ;;  %v334_v56 = vpop.f32.mrb[4].mxu0 }
  0xfb   :  { %750 = vst [vmem:[#allocation5 + $0x98] sm:$0xff] %v266_v55  ;;  %v335_v57 = vadd.f32 %v334_v56, %v1020_v40  ;;  %v411_v58 = vpop.f32.mrb[4].mxu1  ;;  %v336_v59 = vpop.f32.mrb[5].mxu0 }
  0xfc   :  { %v412_v60 = vadd.f32 %v411_v58, %v1020_v40  ;;  %v337_v61 = vadd.f32 %v336_v59, %v1020_v40  ;;  %v413_v62 = vpop.f32.mrb[5].mxu1 }
  0xfd   :  { %734 = vst [vmem:[#allocation5 + $0x20] sm:$0xff] %v335_v57  ;;  %v414_v63 = vadd.f32 %v413_v62, %v1020_v40 }
  0xfe   :  { %736 = vst [vmem:[#allocation5 + $0x30] sm:$0xff] %v412_v60  ;;  %735 = vst [vmem:[#allocation5 + $0x28] sm:$0xff] %v337_v61  ;;  %v340_v1 = vpop.f32.mrb[6].mxu0 }
  0xff   :  { %737 = vst [vmem:[#allocation5 + $0x38] sm:$0xff] %v414_v63  ;;  %v341_v2 = vadd.f32 %v340_v1, %v1025_v0  ;;  %v417_v3 = vpop.f32.mrb[6].mxu1  ;;  %v342_v4 = vpop.f32.mrb[7].mxu0 }
 0x100   :  { %v418_v5 = vadd.f32 %v417_v3, %v1025_v0  ;;  %v343_v6 = vadd.f32 %v342_v4, %v1025_v0  ;;  %v419_v7 = vpop.f32.mrb[7].mxu1 }
 0x101   :  { %751 = vst [vmem:[#allocation5 + $0xa0] sm:$0xff] %v341_v2  ;;  %v420_v8 = vadd.f32 %v419_v7, %v1025_v0 }
 0x102   :  { %753 = vst [vmem:[#allocation5 + $0xb0] sm:$0xff] %v418_v5  ;;  %752 = vst [vmem:[#allocation5 + $0xa8] sm:$0xff] %v343_v6  ;;  %v488_v9 = vpop.f32.mrb[8].mxu0 }
 0x103   :  { %754 = vst [vmem:[#allocation5 + $0xb8] sm:$0xff] %v420_v8  ;;  %v489_v10 = vadd.f32 %v488_v9, %v1020_v40  ;;  %v565_v11 = vpop.f32.mrb[8].mxu1  ;;  %v490_v12 = vpop.f32.mrb[9].mxu0 }
 0x104   :  { %v566_v13 = vadd.f32 %v565_v11, %v1020_v40  ;;  %v491_v14 = vadd.f32 %v490_v12, %v1020_v40  ;;  %v567_v15 = vpop.f32.mrb[9].mxu1 }
 0x105   :  { %738 = vst [vmem:[#allocation5 + $0x40] sm:$0xff] %v489_v10  ;;  %v568_v16 = vadd.f32 %v567_v15, %v1020_v40 }
 0x106   :  { %740 = vst [vmem:[#allocation5 + $0x50] sm:$0xff] %v566_v13  ;;  %739 = vst [vmem:[#allocation5 + $0x48] sm:$0xff] %v491_v14  ;;  %v494_v17 = vpop.f32.mrb[10].mxu0 }
 0x107   :  { %741 = vst [vmem:[#allocation5 + $0x58] sm:$0xff] %v568_v16  ;;  %v495_v18 = vadd.f32 %v494_v17, %v1025_v0  ;;  %v571_v19 = vpop.f32.mrb[10].mxu1  ;;  %v496_v20 = vpop.f32.mrb[11].mxu0 }
 0x108   :  { %v572_v21 = vadd.f32 %v571_v19, %v1025_v0  ;;  %v497_v22 = vadd.f32 %v496_v20, %v1025_v0  ;;  %v573_v23 = vpop.f32.mrb[11].mxu1 }
 0x109   :  { %755 = vst [vmem:[#allocation5 + $0xc0] sm:$0xff] %v495_v18  ;;  %v574_v24 = vadd.f32 %v573_v23, %v1025_v0 }
 0x10a   :  { %757 = vst [vmem:[#allocation5 + $0xd0] sm:$0xff] %v572_v21  ;;  %756 = vst [vmem:[#allocation5 + $0xc8] sm:$0xff] %v497_v22  ;;  %v642_v25 = vpop.f32.mrb[12].mxu0 }
 0x10b   :  { %758 = vst [vmem:[#allocation5 + $0xd8] sm:$0xff] %v574_v24  ;;  %v643_v26 = vadd.f32 %v642_v25, %v1020_v40  ;;  %v719_v27 = vpop.f32.mrb[12].mxu1  ;;  %v644_v28 = vpop.f32.mrb[13].mxu0 }
 0x10c   :  { %v720_v29 = vadd.f32 %v719_v27, %v1020_v40  ;;  %v645_v30 = vadd.f32 %v644_v28, %v1020_v40  ;;  %v721_v31 = vpop.f32.mrb[13].mxu1 }
 0x10d   :  { %742 = vst [vmem:[#allocation5 + $0x60] sm:$0xff] %v643_v26  ;;  %v722_v32 = vadd.f32 %v721_v31, %v1020_v40 }
 0x10e   :  { %744 = vst [vmem:[#allocation5 + $0x70] sm:$0xff] %v720_v29  ;;  %743 = vst [vmem:[#allocation5 + $0x68] sm:$0xff] %v645_v30  ;;  %v648_v33 = vpop.f32.mrb[14].mxu0 }
 0x10f   :  { %746 = vst.msk [vmem:[#allocation5 + $0x78] sm:$0xff] %vm745_vm1, %v722_v32  ;;  %v649_v34 = vadd.f32 %v648_v33, %v1025_v0  ;;  %v725_v36 = vpop.f32.mrb[14].mxu1  ;;  %v650_v37 = vpop.f32.mrb[15].mxu0 }
 0x110   :  { %v726_v38 = vadd.f32 %v725_v36, %v1025_v0  ;;  %v651_v39 = vadd.f32 %v650_v37, %v1025_v0  ;;  %v727_v41 = vpop.f32.mrb[15].mxu1 }
 0x111   :  { %759 = vst [vmem:[#allocation5 + $0xe0] sm:$0xff] %v649_v34  ;;  %v728_v42 = vadd.f32 %v727_v41, %v1025_v0 }
 0x112   :  { %761 = vst [vmem:[#allocation5 + $0xf0] sm:$0xff] %v726_v38  ;;  %760 = vst [vmem:[#allocation5 + $0xe8] sm:$0xff] %v651_v39 }
 0x113   :  { %762 = vst.msk [vmem:[#allocation5 + $0xf8] sm:$0xff] %vm745_vm1, %v728_v42 }
 0x114   :  { %900 = shalt.err (!%p897_p12)
}
 0x115   :  { %s901_s9 = scalar_lea.hbm %s1076_s3, 4096 }
 0x116   :  { %p902_p13 = scmp.ne.s32.totalorder %s1076_s3, %s901_s9  ;;  %p905_p0 = scmp.lt.u32.totalorder %s901_s9, %s1076_s3 }
 0x118   :  { %p907_p1 = pnand %p905_p0, %p902_p13 }
 0x11a   :  { %910 = shalt.err (!%p907_p1)
}
 0x11b   :  { %774 = dma.vmem_to_hbm [thread:$0]  %s769_s5, 4096, %s1076_s3, [#allocation4], %s916_s22, %s916_s22, %s917_s23  }
 0x11c   :  { %913 = dma.done.wait [#allocation4], 4096  }
 0x11d   :  { %914 = vsyncadd [#allocation4], 4294963200 }
 0x11e   :  { %778 = vsyncpa [#allocation3], 1 }
 0x11f   :  { %779 = vsyncpa [#allocation4], 1 }

</bundles_post_ra>
